<compile_context>
chip_gen: v7x
topology: tpu7x:2x2x1
jax: 0.10.0
libtpu: 0.0.40
codegen_flags: <defaults>
</compile_context>

<pallas_src>
import functools

import jax
import jax.numpy as jnp
from jax.experimental import pallas as pl
from jax.experimental.pallas import tpu as pltpu


def _round_up(v, m):
    return (v + m - 1) // m * m


def _gin_kernel(adj_ref, xc_ref, xr_ref, w1_ref, b1_ref, w2_ref, b2_ref,
                o_ref, acc_ref, *, eps):
    k = pl.program_id(1)

    @pl.when(k == 0)
    def _():
        acc_ref[...] = jnp.zeros_like(acc_ref)

    # Partial neighborhood aggregation: (TM, TK) @ (TK, Din) on the MXU.
    # adj tile arrives as bf16 (exact for 0/1 entries); widen to f32 so the
    # accumulation matches the f32 reference bit-for-bit per product.
    acc_ref[...] += jnp.dot(adj_ref[...].astype(jnp.float32), xc_ref[...],
                            preferred_element_type=jnp.float32)

    @pl.when(k == pl.num_programs(1) - 1)
    def _():
        # Finalize this row tile: GIN combine + fused 2-layer MLP.
        h = xr_ref[...] + (1.0 + eps) * acc_ref[...]
        h1 = jnp.dot(h, w1_ref[...],
                     preferred_element_type=jnp.float32) + b1_ref[...]
        h1 = jnp.maximum(h1, 0.0)
        out = jnp.dot(h1, w2_ref[...],
                      preferred_element_type=jnp.float32) + b2_ref[...]
        o_ref[...] = out.astype(o_ref.dtype)


def gin_layer(x, adj, w1, b1, w2, b2, *, eps=0.0, tm=256, tk=1024):
    """Pallas GIN layer forward.

    x:   (N, Din) float32 node features
    adj: (N, N)   adjacency (0/1); streamed to the kernel as bfloat16
    w1:  (Din, Dout)  float32 (transpose of torch Linear.weight)
    b1:  (Dout,)      float32
    w2:  (Dout, Dout) float32
    b2:  (Dout,)      float32
    """
    n, d_in = x.shape
    d_out = w1.shape[1]

    # Clamp tile sizes for small graphs while keeping (8, 128) alignment.
    tm = min(tm, _round_up(n, 8))
    tk = min(tk, _round_up(n, 128))

    n_rows = _round_up(n, tm)        # padded row extent of adj / x / out
    n_cols = _round_up(n, tk)        # padded reduction extent of adj columns
    d_out_p = _round_up(d_out, 128)  # lane-dense output feature dim

    f32 = jnp.float32
    # adj streamed as bf16 (exact for 0/1 entries).  int8 would quarter the
    # bytes on v5e/v6e, but v7x's MXU has no integer path, so bf16 is the
    # portable choice.
    adj_p = jnp.zeros((n_rows, n_cols), jnp.bfloat16).at[:n, :n].set(
        adj.astype(jnp.bfloat16))
    x_rows = jnp.zeros((n_rows, d_in), f32).at[:n, :].set(x.astype(f32))
    x_cols = jnp.zeros((n_cols, d_in), f32).at[:n, :].set(x.astype(f32))

    # Zero-pad the MLP parameters out to the lane-dense feature dim; the
    # extra columns/rows contribute exactly zero and are sliced off below.
    w1_p = jnp.zeros((d_in, d_out_p), f32).at[:, :d_out].set(w1.astype(f32))
    b1_p = jnp.zeros((1, d_out_p), f32).at[0, :d_out].set(b1.astype(f32))
    w2_p = jnp.zeros((d_out_p, d_out_p), f32).at[:d_out, :d_out].set(
        w2.astype(f32))
    b2_p = jnp.zeros((1, d_out_p), f32).at[0, :d_out].set(b2.astype(f32))

    grid = (n_rows // tm, n_cols // tk)
    kernel = functools.partial(_gin_kernel, eps=float(eps))

    out_p = pl.pallas_call(
        kernel,
        out_shape=jax.ShapeDtypeStruct((n_rows, d_out_p), f32),
        grid=grid,
        in_specs=[
            pl.BlockSpec((tm, tk), lambda i, k: (i, k)),           # adj tile
            pl.BlockSpec((tk, d_in), lambda i, k: (k, 0)),         # x (reduction rows)
            pl.BlockSpec((tm, d_in), lambda i, k: (i, 0)),         # x (output rows)
            pl.BlockSpec((d_in, d_out_p), lambda i, k: (0, 0)),    # resident w1
            pl.BlockSpec((1, d_out_p), lambda i, k: (0, 0)),       # resident b1
            pl.BlockSpec((d_out_p, d_out_p), lambda i, k: (0, 0)), # resident w2
            pl.BlockSpec((1, d_out_p), lambda i, k: (0, 0)),       # resident b2
        ],
        out_specs=pl.BlockSpec((tm, d_out_p), lambda i, k: (i, 0)),
        scratch_shapes=[pltpu.VMEM((tm, d_in), f32)],
        compiler_params=pltpu.CompilerParams(
            dimension_semantics=("parallel", "arbitrary")),
    )(adj_p, x_cols, x_rows, w1_p, b1_p, w2_p, b2_p)

    return out_p[:n, :d_out]


def _reference(x, adj, w1, b1, w2, b2, eps=0.0):
    h = x + (1.0 + eps) * (adj @ x)
    h1 = jnp.maximum(h @ w1 + b1, 0.0)
    return h1 @ w2 + b2


if __name__ == "__main__":
    # Small but tiling-exercising example: 512 nodes, input_dim=64, output_dim=32.
    N, D_IN, D_OUT = 512, 64, 32
    EPS = 0.25

    key = jax.random.PRNGKey(0)
    k_x, k_adj, k_w1, k_b1, k_w2, k_b2 = jax.random.split(key, 6)

    x = jax.random.normal(k_x, (N, D_IN), dtype=jnp.float32)
    # Symmetric 0/1 adjacency without self-loops (typical GIN input).
    a = (jax.random.uniform(k_adj, (N, N)) > 0.5).astype(jnp.float32)
    adj = jnp.triu(a, k=1)
    adj = adj + adj.T

    # Deterministic parameter init (shapes follow nn.Linear in the module);
    # weights stored as (in, out) == torch_weight.T.
    w1 = jax.random.normal(k_w1, (D_IN, D_OUT), dtype=jnp.float32) * (1.0 / jnp.sqrt(D_IN))
    b1 = jax.random.normal(k_b1, (D_OUT,), dtype=jnp.float32) * 0.01
    w2 = jax.random.normal(k_w2, (D_OUT, D_OUT), dtype=jnp.float32) * (1.0 / jnp.sqrt(D_OUT))
    b2 = jax.random.normal(k_b2, (D_OUT,), dtype=jnp.float32) * 0.01

    # tm/tk chosen so the demo actually runs a multi-step grid (4, 2);
    # production defaults (tm=256, tk=1024) favor fewer, bigger steps.
    out = gin_layer(x, adj, w1, b1, w2, b2, eps=EPS, tm=128, tk=256)
    out = jax.block_until_ready(out)

    ref = _reference(x, adj, w1, b1, w2, b2, eps=EPS)
    assert out.shape == (N, D_OUT)
    assert jnp.allclose(out, ref, atol=1e-3, rtol=1e-3), "mismatch vs reference"

    # TODO(synk): train_eps (eps as a learnable nn.Parameter) is a training-time
    # concern; forward math is identical, so eps is passed as a static scalar.
    print("KERNEL_OK")
</pallas_src>

<mosaic_0001>
module attributes {stable_mosaic.version = 11 : i64} {
  func.func @_gin_kernel(%arg0: i32, %arg1: i32, %arg2: memref<128x256xbf16, #tpu.memory_space<vmem>>, %arg3: memref<256x64xf32, #tpu.memory_space<vmem>>, %arg4: memref<128x64xf32, #tpu.memory_space<vmem>>, %arg5: memref<64x128xf32, #tpu.memory_space<vmem>>, %arg6: memref<1x128xf32, #tpu.memory_space<vmem>>, %arg7: memref<128x128xf32, #tpu.memory_space<vmem>>, %arg8: memref<1x128xf32, #tpu.memory_space<vmem>>, %arg9: memref<128x128xf32, #tpu.memory_space<vmem>>, %arg10: memref<128x64xf32, #tpu.memory_space<vmem>>) attributes {dimension_semantics = [#tpu.dimension_semantics<parallel>, #tpu.dimension_semantics<arbitrary>], iteration_bounds = array<i64: 4, 2>, scalar_prefetch = 0 : i64, scratch_operands = 1 : i64, tpu.core_type = #tpu.core_type<tc>, window_params = [{transform_indices = @transform_0, window_bounds = array<i64: 128, 256>}, {transform_indices = @transform_1, window_bounds = array<i64: 256, 64>}, {transform_indices = @transform_2, window_bounds = array<i64: 128, 64>}, {pipeline_mode = #tpu.pipeline_mode<synchronous>, transform_indices = @transform_3, window_bounds = array<i64: 64, 128>}, {pipeline_mode = #tpu.pipeline_mode<synchronous>, transform_indices = @transform_4, window_bounds = array<i64: 1, 128>}, {pipeline_mode = #tpu.pipeline_mode<synchronous>, transform_indices = @transform_5, window_bounds = array<i64: 128, 128>}, {pipeline_mode = #tpu.pipeline_mode<synchronous>, transform_indices = @transform_6, window_bounds = array<i64: 1, 128>}, {transform_indices = @transform_7, window_bounds = array<i64: 128, 128>}]} {
    %c0_i32 = arith.constant 0 : i32
    %0 = arith.cmpi eq, %arg1, %c0_i32 : i32
    %1 = arith.extui %0 : i1 to i32
    %c0_i32_0 = arith.constant 0 : i32
    %2 = arith.cmpi ne, %1, %c0_i32_0 : i32
    scf.if %2 {
      %cst_9 = arith.constant 0.000000e+00 : f32
      %13 = vector.broadcast %cst_9 : f32 to vector<128x64xf32>
      %c0_10 = arith.constant 0 : index
      %c0_11 = arith.constant 0 : index
      %14 = vector.load %arg10[%c0_10, %c0_11] : memref<128x64xf32, #tpu.memory_space<vmem>>, vector<128x64xf32>
      tpu.vector_store %arg10[%c0_10, %c0_11], %13 {strides = array<i32>} : memref<128x64xf32, #tpu.memory_space<vmem>>, vector<128x64xf32>,
    } else {
    }
    %c0 = arith.constant 0 : index
    %c0_1 = arith.constant 0 : index
    %3 = vector.load %arg10[%c0, %c0_1] : memref<128x64xf32, #tpu.memory_space<vmem>>, vector<128x64xf32>
    %c0_2 = arith.constant 0 : index
    %c0_3 = arith.constant 0 : index
    %4 = vector.load %arg2[%c0_2, %c0_3] : memref<128x256xbf16, #tpu.memory_space<vmem>>, vector<128x256xbf16>
    %5 = arith.extf %4 : vector<128x256xbf16> to vector<128x256xf32>
    %c0_4 = arith.constant 0 : index
    %c0_5 = arith.constant 0 : index
    %6 = vector.load %arg3[%c0_4, %c0_5] : memref<256x64xf32, #tpu.memory_space<vmem>>, vector<256x64xf32>
    %cst = arith.constant dense<0.000000e+00> : vector<128x64xf32>
    %7 = tpu.matmul %5, %6, %cst {dimension_numbers = #tpu.dot_dimension_numbers<[1], [0], [0], [1], [0, 0, 1, 1], [], []>} : vector<128x256xf32>, vector<256x64xf32>, vector<128x64xf32> -> vector<128x64xf32>
    %8 = arith.addf %3, %7 : vector<128x64xf32>
    %c0_6 = arith.constant 0 : index
    %c0_7 = arith.constant 0 : index
    %9 = vector.load %arg10[%c0_6, %c0_7] : memref<128x64xf32, #tpu.memory_space<vmem>>, vector<128x64xf32>
    tpu.vector_store %arg10[%c0_6, %c0_7], %8 {strides = array<i32>} : memref<128x64xf32, #tpu.memory_space<vmem>>, vector<128x64xf32>,
    %c1_i32 = arith.constant 1 : i32
    %10 = arith.cmpi eq, %arg1, %c1_i32 : i32
    %11 = arith.extui %10 : i1 to i32
    %c0_i32_8 = arith.constant 0 : i32
    %12 = arith.cmpi ne, %11, %c0_i32_8 : i32
    scf.if %12 {
      %c0_9 = arith.constant 0 : index
      %c0_10 = arith.constant 0 : index
      %13 = vector.load %arg4[%c0_9, %c0_10] : memref<128x64xf32, #tpu.memory_space<vmem>>, vector<128x64xf32>
      %c0_11 = arith.constant 0 : index
      %c0_12 = arith.constant 0 : index
      %14 = vector.load %arg10[%c0_11, %c0_12] : memref<128x64xf32, #tpu.memory_space<vmem>>, vector<128x64xf32>
      %cst_13 = arith.constant 1.250000e+00 : f32
      %15 = vector.broadcast %cst_13 : f32 to vector<128x64xf32>
      %16 = arith.mulf %15, %14 : vector<128x64xf32>
      %17 = arith.addf %13, %16 : vector<128x64xf32>
      %c0_14 = arith.constant 0 : index
      %c0_15 = arith.constant 0 : index
      %18 = vector.load %arg5[%c0_14, %c0_15] : memref<64x128xf32, #tpu.memory_space<vmem>>, vector<64x128xf32>
      %cst_16 = arith.constant dense<0.000000e+00> : vector<128x128xf32>
      %19 = tpu.matmul %17, %18, %cst_16 {dimension_numbers = #tpu.dot_dimension_numbers<[1], [0], [0], [1], [0, 0, 1, 1], [], []>} : vector<128x64xf32>, vector<64x128xf32>, vector<128x128xf32> -> vector<128x128xf32>
      %c0_17 = arith.constant 0 : index
      %c0_18 = arith.constant 0 : index
      %20 = vector.load %arg6[%c0_17, %c0_18] : memref<1x128xf32, #tpu.memory_space<vmem>>, vector<1x128xf32>
      %21 = vector.broadcast %20 : vector<1x128xf32> to vector<128x128xf32>
      %22 = arith.addf %19, %21 : vector<128x128xf32>
      %cst_19 = arith.constant 0.000000e+00 : f32
      %23 = vector.broadcast %cst_19 : f32 to vector<128x128xf32>
      %24 = arith.maximumf %22, %23 : vector<128x128xf32>
      %c0_20 = arith.constant 0 : index
      %c0_21 = arith.constant 0 : index
      %25 = vector.load %arg7[%c0_20, %c0_21] : memref<128x128xf32, #tpu.memory_space<vmem>>, vector<128x128xf32>
      %cst_22 = arith.constant dense<0.000000e+00> : vector<128x128xf32>
      %26 = tpu.matmul %24, %25, %cst_22 {dimension_numbers = #tpu.dot_dimension_numbers<[1], [0], [0], [1], [0, 0, 1, 1], [], []>} : vector<128x128xf32>, vector<128x128xf32>, vector<128x128xf32> -> vector<128x128xf32>
      %c0_23 = arith.constant 0 : index
      %c0_24 = arith.constant 0 : index
      %27 = vector.load %arg8[%c0_23, %c0_24] : memref<1x128xf32, #tpu.memory_space<vmem>>, vector<1x128xf32>
      %28 = vector.broadcast %27 : vector<1x128xf32> to vector<128x128xf32>
      %29 = arith.addf %26, %28 : vector<128x128xf32>
      %c0_25 = arith.constant 0 : index
      %c0_26 = arith.constant 0 : index
      %30 = vector.load %arg9[%c0_25, %c0_26] : memref<128x128xf32, #tpu.memory_space<vmem>>, vector<128x128xf32>
      tpu.vector_store %arg9[%c0_25, %c0_26], %29 {strides = array<i32>} : memref<128x128xf32, #tpu.memory_space<vmem>>, vector<128x128xf32>,
    } else {
    }
    return
  }
  func.func @transform_0(%arg0: i32, %arg1: i32) -> (i32, i32) {
    %c0_i32 = arith.constant 0 : i32
    return %arg0, %arg1 : i32, i32
  }
  func.func @transform_1(%arg0: i32, %arg1: i32) -> (i32, i32) {
    %c0_i32 = arith.constant 0 : i32
    %c0_i32_0 = arith.constant 0 : i32
    return %arg1, %c0_i32 : i32, i32
  }
  func.func @transform_2(%arg0: i32, %arg1: i32) -> (i32, i32) {
    %c0_i32 = arith.constant 0 : i32
    %c0_i32_0 = arith.constant 0 : i32
    return %arg0, %c0_i32 : i32, i32
  }
  func.func @transform_3(%arg0: i32, %arg1: i32) -> (i32, i32) {
    %c0_i32 = arith.constant 0 : i32
    %c0_i32_0 = arith.constant 0 : i32
    %c0_i32_1 = arith.constant 0 : i32
    return %c0_i32, %c0_i32_0 : i32, i32
  }
  func.func @transform_4(%arg0: i32, %arg1: i32) -> (i32, i32) {
    %c0_i32 = arith.constant 0 : i32
    %c0_i32_0 = arith.constant 0 : i32
    %c0_i32_1 = arith.constant 0 : i32
    return %c0_i32, %c0_i32_0 : i32, i32
  }
  func.func @transform_5(%arg0: i32, %arg1: i32) -> (i32, i32) {
    %c0_i32 = arith.constant 0 : i32
    %c0_i32_0 = arith.constant 0 : i32
    %c0_i32_1 = arith.constant 0 : i32
    return %c0_i32, %c0_i32_0 : i32, i32
  }
  func.func @transform_6(%arg0: i32, %arg1: i32) -> (i32, i32) {
    %c0_i32 = arith.constant 0 : i32
    %c0_i32_0 = arith.constant 0 : i32
    %c0_i32_1 = arith.constant 0 : i32
    return %c0_i32, %c0_i32_0 : i32, i32
  }
  func.func @transform_7(%arg0: i32, %arg1: i32) -> (i32, i32) {
    %c0_i32 = arith.constant 0 : i32
    %c0_i32_0 = arith.constant 0 : i32
    return %arg0, %c0_i32 : i32, i32
  }
}

</mosaic_0001>

<bundles_post_ra>
// kernel: tpu_custom_call.1
= control target key start
LH: loop header
LB: loop body
LE: loop exit
PB: predicated region body
PF: predicated region fallthrough
CT: control target
= control target key end

     0   :  { %s2376_s0 = inlined_call_operand.vmem [shape: bf16[512,512], index: 0, kind: input, shape index: {}]   ;;  %s2377_s1 = inlined_call_operand.vmem [shape: f32[512,64], index: 1, kind: input, shape index: {}]   ;;  %s2378_s2 = inlined_call_operand.vmem [shape: f32[512,64], index: 2, kind: input, shape index: {}]   ;;  %s2379_s3 = inlined_call_operand.vmem [shape: f32[64,128], index: 3, kind: input, shape index: {}]   ;;  %s2380_s4 = inlined_call_operand.vmem [shape: f32[1,128], index: 4, kind: input, shape index: {}]   ;;  %s2381_s5 = inlined_call_operand.vmem [shape: f32[128,128], index: 5, kind: input, shape index: {}]   ;;  %s2382_s6 = inlined_call_operand.vmem [shape: f32[1,128], index: 6, kind: input, shape index: {}]   ;;  %s2383_s7 = inlined_call_operand.hbm [shape: f32[512,128], index: 7, kind: output, shape index: {}]  }
   0x1   :  { %2390 = sst [smem:[#allocation12_spill]] %s2376_s0 }
   0x2   :  { %12 = vsyncpa [#allocation5], 0 }
   0x3   :  { %14 = vsyncpa [#allocation5 + $0x1], 0  ;;  %s1960_s24 = smov 0   ;;  %s1962_s25 = smov 0  }
   0x4   :  { %s1964_s26 = smov 0   ;;  %s1966_s27 = smov 0  }
   0x5   :  { %s1968_s28 = smov 0   ;;  %s1970_s29 = smov 0  }
   0x6   :  { %s1972_s30 = smov 0   ;;  %s1974_s8 = smov 0  }
   0x7   :  { %s1976_s9 = smov 0   ;;  %s1978_s10 = smov 0  }
   0x8 LB: > { %2391 = sst [smem:[#allocation7_spill]] %s1906_s8  ;;  %s1327_s11 = sadd.s32 4294967295, %s1914_s10   ;;  %s1914_s10 = sphi %s1978_s10, %s20_s10   ;;  %s1910_s9 = sphi %s1976_s9, %s2405_s9   ;;  %s1906_s8 = sphi %s1974_s8, %s2404_s8   ;;  %s1902_s30 = sphi %s1972_s30, %s2403_s30   ;;  %s1898_s29 = sphi %s1970_s29, %s2402_s29   ;;  %s1894_s28 = sphi %s1968_s28, %s2410_s28   ;;  %s1890_s27 = sphi %s1966_s27, %s2409_s27   ;;  %s1886_s26 = sphi %s1964_s26, %s2408_s26   ;;  %s1882_s25 = sphi %s1962_s25, %s2407_s25   ;;  %s1878_s24 = sphi %s1960_s24, %s2406_s24  }
   0x9   : > { %2392 = sst [smem:[#allocation8_spill]] %s1910_s9  ;;  %s1328_s12 = sadd.s32 4294967294, %s1914_s10  }
   0xa   : > { %s29_s13 = sadd.s32 1, %s1906_s8  ;;  %s32_s14 = sadd.s32 1, %s1910_s9 }
   0xb   : > { %p30_p0 = scmp.ge.s32.totalorder %s29_s13, 2  ;;  %s41_s15 = sadd.s32 1, %s1894_s28 }
   0xc   : > { %p48_p1 = scmp.ne.s32.totalorder %s1894_s28, %s1890_s27  ;;  %p49_p2 = scmp.eq.s32.totalorder %s1914_s10, 0 }
   0xd   : > { %s2412_s13 = smov (%p30_p0, %s29_s13), 0  ;;  %s2414_s14 = smov (!%p30_p0, %s32_s14), %s1910_s9 }
   0xe   : > { %2393 = sst [smem:[#allocation9_spill]] %s2412_s13  ;;  %s37_s16 = ssub.s32 %s1906_s8, %s2412_s13 }
   0xf   : > { %p2023_p3 = por %p49_p2, %p48_p1  ;;  %p34_p4 = scmp.ge.s32.totalorder %s2414_s14, 4 }
  0x10   : > { %s203_s18 = sadd.s32 1, %s1886_s26  ;;  %p213_p5 = scmp.ne.s32.totalorder %s1886_s26, %s1882_s25 }
  0x11   : > { %p214_p6 = scmp.eq.s32.totalorder %s1327_s11, 7  ;;  %s2416_s14 = smov (%p34_p4, %s2414_s14), 0 }
  0x12   : > { %2395 = sst [smem:[#allocation10_spill]] %s2416_s14  ;;  %p219_p8 = scmp.ne.s32.totalorder %s1882_s25, %s1878_s24 }
  0x13   : > { %p2032_p7 = por %p214_p6, %p213_p5  ;;  %s36_s20 = ssub.s32 %s1910_s9, %s2416_s14 }
  0x14   : > { %p220_p9 = scmp.eq.s32.totalorder %s1328_s12, 7  ;;  %s38_s21 = sor.u32 %s37_s16, %s36_s20 }
  0x15   : > { %p201_p10 = scmp.eq.s32.totalorder %s36_s20, 0  ;;  %p39_p11 = scmp.eq.s32.totalorder %s38_s21, 0 }
  0x16   : > { %p2040_p12 = por %p220_p9, %p219_p8  ;;  %p1330_p13 = scmp.ge.s32.totalorder %s1914_s10, 8 }
  0x17   : > { %s2045_s23 = scalar_select %p201_p10, %s1886_s26, %s203_s18  }
  0x18   : > { %s2397_s22 = scalar_select %p2040_p12, 1, 0 }
  0x19   : > { %s2048_s11 = scalar_select %p39_p11, %s1894_s28, %s41_s15  }
  0x1a   : > { %2398 = sst [smem:[#allocation11_spill]] %s2397_s22  ;;  %248 = sbr.rel (%p1330_p13) target bundleno = 51 (0x33), region = 32 }
  0x21   : > { %251 = sbr.rel (!%p2023_p3) target bundleno = 51 (0x33), region = 36  ;;  %s253_s12 = sand.u32 (%p2023_p3), 1, %s1894_s28  }
  0x22   : > { %s1333_s16 = sshll.u32 (%p2023_p3), %s1906_s8, 1  ;;  %s1331_s20 = sshll.u32 (%p2023_p3), %s253_s12, 7 }
  0x23   : > { %s1368_s21 = sshll.u32 (%p2023_p3), %s1910_s9, 6  ;;  %s2399_s0 = sld [smem:[#allocation12_spill]] (%p2023_p3) }
  0x24   : > { %s259_s14 = sadd.s32 (%p2023_p3), %s1368_s21, %s1333_s16  ;;  %s255_s17 = scalar_lea.vmem (%p2023_p3), [#allocation3], %s1331_s20 }
  0x25   : > { %s1335_s13 = sshll.u32 (%p2023_p3), %s259_s14, 2 }
  0x29   : > { %s2059_s15 = scalar_lea.vmem %s2399_s0, %s1335_s13 }
  0x2a   : > { %v319_v0 = vld [vmem:[%s2059_s15] sm:$0xff]  ;;  %v321_v1 = vld [vmem:[%s2059_s15 + $0x10] sm:$0xff] }
  0x2b   : > { %v323_v2 = vld [vmem:[%s2059_s15 + $0x20] sm:$0xff]  ;;  %320 = vst [vmem:[%s255_s17] sm:$0xff] %v319_v0  ;;  %322 = vst [vmem:[%s255_s17 + $0x8] sm:$0xff] %v321_v1  ;;  %v325_v3 = vld [vmem:[%s2059_s15 + $0x30] sm:$0xff] }
  0x2c   : > { %324 = vst [vmem:[%s255_s17 + $0x10] sm:$0xff] %v323_v2  ;;  %v327_v4 = vld [vmem:[%s2059_s15 + $0x40] sm:$0xff]  ;;  %v329_v5 = vld [vmem:[%s2059_s15 + $0x50] sm:$0xff]  ;;  %326 = vst [vmem:[%s255_s17 + $0x18] sm:$0xff] %v325_v3 }
  0x2d   : > { %328 = vst [vmem:[%s255_s17 + $0x20] sm:$0xff] %v327_v4  ;;  %330 = vst [vmem:[%s255_s17 + $0x28] sm:$0xff] %v329_v5  ;;  %v331_v6 = vld [vmem:[%s2059_s15 + $0x60] sm:$0xff]  ;;  %v333_v7 = vld [vmem:[%s2059_s15 + $0x70] sm:$0xff] }
  0x2e   : > { %v335_v8 = vld [vmem:[%s2059_s15 + $0x80] sm:$0xff]  ;;  %332 = vst [vmem:[%s255_s17 + $0x30] sm:$0xff] %v331_v6  ;;  %334 = vst [vmem:[%s255_s17 + $0x38] sm:$0xff] %v333_v7  ;;  %v337_v9 = vld [vmem:[%s2059_s15 + $0x90] sm:$0xff] }
  0x2f   : > { %336 = vst [vmem:[%s255_s17 + $0x40] sm:$0xff] %v335_v8  ;;  %v339_v10 = vld [vmem:[%s2059_s15 + $0xa0] sm:$0xff]  ;;  %v341_v11 = vld [vmem:[%s2059_s15 + $0xb0] sm:$0xff]  ;;  %338 = vst [vmem:[%s255_s17 + $0x48] sm:$0xff] %v337_v9 }
  0x30   : > { %340 = vst [vmem:[%s255_s17 + $0x50] sm:$0xff] %v339_v10  ;;  %342 = vst [vmem:[%s255_s17 + $0x58] sm:$0xff] %v341_v11  ;;  %v343_v12 = vld [vmem:[%s2059_s15 + $0xc0] sm:$0xff]  ;;  %v345_v13 = vld [vmem:[%s2059_s15 + $0xd0] sm:$0xff] }
  0x31   : > { %v347_v14 = vld [vmem:[%s2059_s15 + $0xe0] sm:$0xff]  ;;  %344 = vst [vmem:[%s255_s17 + $0x60] sm:$0xff] %v343_v12  ;;  %346 = vst [vmem:[%s255_s17 + $0x68] sm:$0xff] %v345_v13  ;;  %v349_v15 = vld [vmem:[%s2059_s15 + $0xf0] sm:$0xff] }
  0x32   : > { %348 = vst [vmem:[%s255_s17 + $0x70] sm:$0xff] %v347_v14  ;;  %350 = vst [vmem:[%s255_s17 + $0x78] sm:$0xff] %v349_v15 }
  0x33 PF: > { %p1336_p0 = scmp.ge.s32.totalorder %s1914_s10, 1  ;;  %p373_p1 = scmp.lt.s32.totalorder %s1914_s10, 9 }
  0x35   : > { %p374_p2 = pnand %p1336_p0, %p373_p1 }
  0x36   : > { %s380_s13 = sand.u32 (!%p374_p2), 1, %s1890_s27   ;;  %s2389_s14 = sand.u32 (!%p374_p2), 1, %s1882_s25  }
  0x37   : > { %377 = sbr.rel (%p374_p2) target bundleno = 840 (0x348), region = 82  ;;  %s1337_s22 = sshll.u32 (!%p374_p2), %s380_s13, 7 }
  0x38   : > { %s1338_s12 = sshll.u32 (!%p374_p2), %s2389_s14, 7  ;;  %s1339_s16 = sshll.u32 (!%p374_p2), %s1898_s29, 5 }
  0x39   : > { %s1341_s20 = sshll.u32 (!%p374_p2), %s1902_s30, 4  ;;  %p424_p3 = scmp.lt.s32.totalorder (!%p374_p2), %s1339_s16, 63 }
  0x3a   : > { %p430_p4 = scmp.lt.s32.totalorder (!%p374_p2), %s1341_s20, 63  ;;  %s2095_s13 = scalar_lea.vmem (!%p374_p2), [#allocation3], %s1337_s22 }
  0x3b   : > { %s2097_s14 = scalar_lea.vmem (!%p374_p2), [#allocation4], %s1338_s12  ;;  %p1343_p5 = scmp.ne.s32.totalorder (!%p374_p2), %s1898_s29, 0 }
  0x3e   : > { %s2418_s16 = smov (!%p424_p3, %s1339_s16), 63  ;;  %s2420_s20 = smov (!%p430_p4, %s1341_s20), 63 }
  0x3f   : > { %s1340_s21 = sshll.u32 %s2418_s16, 3  ;;  %s1342_s0 = sshll.u32 %s2420_s20, 3  ;;  %vm440_vm0 = vcmask (!%p1343_p5), 523264   ;;  %v1916_v16 = vmov (!%p1343_p5), 0.0  }
  0x40   : > { %s2088_s17 = scalar_lea.vmem %s2377_s1, %s1340_s21  ;;  %s2093_s27 = scalar_lea.vmem %s2378_s2, %s1342_s0  ;;  %441 = vst.msk [vmem:[#allocation2] sm:$0xff] (!%p1343_p5), %vm440_vm0, %v1916_v16  ;;  %442 = vst.msk [vmem:[#allocation2 + $0x8] sm:$0xff] (!%p1343_p5), %vm440_vm0, %v1916_v16 }
  0x41   : > { %439 = sbr.rel (%p1343_p5) target bundleno = 72 (0x48), region = 90  ;;  %443 = vst.msk [vmem:[#allocation2 + $0x10] sm:$0xff] (!%p1343_p5), %vm440_vm0, %v1916_v16  ;;  %444 = vst.msk [vmem:[#allocation2 + $0x18] sm:$0xff] (!%p1343_p5), %vm440_vm0, %v1916_v16 }
  0x42   : > { %445 = vst.msk [vmem:[#allocation2 + $0x20] sm:$0xff] (!%p1343_p5), %vm440_vm0, %v1916_v16  ;;  %446 = vst.msk [vmem:[#allocation2 + $0x28] sm:$0xff] (!%p1343_p5), %vm440_vm0, %v1916_v16 }
  0x43   : > { %447 = vst.msk [vmem:[#allocation2 + $0x30] sm:$0xff] (!%p1343_p5), %vm440_vm0, %v1916_v16  ;;  %448 = vst.msk [vmem:[#allocation2 + $0x38] sm:$0xff] (!%p1343_p5), %vm440_vm0, %v1916_v16 }
  0x44   : > { %449 = vst.msk [vmem:[#allocation2 + $0x40] sm:$0xff] (!%p1343_p5), %vm440_vm0, %v1916_v16  ;;  %450 = vst.msk [vmem:[#allocation2 + $0x48] sm:$0xff] (!%p1343_p5), %vm440_vm0, %v1916_v16 }
  0x45   : > { %451 = vst.msk [vmem:[#allocation2 + $0x50] sm:$0xff] (!%p1343_p5), %vm440_vm0, %v1916_v16  ;;  %452 = vst.msk [vmem:[#allocation2 + $0x58] sm:$0xff] (!%p1343_p5), %vm440_vm0, %v1916_v16 }
  0x46   : > { %453 = vst.msk [vmem:[#allocation2 + $0x60] sm:$0xff] (!%p1343_p5), %vm440_vm0, %v1916_v16  ;;  %454 = vst.msk [vmem:[#allocation2 + $0x68] sm:$0xff] (!%p1343_p5), %vm440_vm0, %v1916_v16 }
  0x47   : > { %455 = vst.msk [vmem:[#allocation2 + $0x70] sm:$0xff] (!%p1343_p5), %vm440_vm0, %v1916_v16  ;;  %456 = vst.msk [vmem:[#allocation2 + $0x78] sm:$0xff] (!%p1343_p5), %vm440_vm0, %v1916_v16 }
  0x48 PF: > { %v537_v17 = vld [vmem:[%s2088_s17 + $0x80] sm:$0xff]  ;;  %v538_v18 = vld [vmem:[%s2088_s17 + $0x88] sm:$0xff]  ;;  %v539_v22 = vld [vmem:[%s2088_s17 + $0x90] sm:$0xff]  ;;  %vm714_vm1 = vcmask 523264   ;;  %p1344_p6 = scmp.ne.s32.totalorder %s1898_s29, 1 }
  0x49   : > { %v521_v19 = vld [vmem:[%s2088_s17] sm:$0xff]  ;;  %v1602_v20 = vpack.c.bf16 %v538_v18, %v537_v17  ;;  %v522_v21 = vld [vmem:[%s2088_s17 + $0x8] sm:$0xff]  ;;  %v540_v23 = vld [vmem:[%s2088_s17 + $0x98] sm:$0xff] }
  0x4a   : > { %v1604_v24 = vpack.c.bf16 %v522_v21, %v521_v19  ;;  %v1606_v25 = vpack.c.bf16 %v540_v23, %v539_v22  ;;  %v523_v26 = vld [vmem:[%s2088_s17 + $0x10] sm:$0xff]  ;;  %v524_v27 = vld [vmem:[%s2088_s17 + $0x18] sm:$0xff]  ;;  %v541_v28 = vld [vmem:[%s2088_s17 + $0xa0] sm:$0xff] }
  0x4b   : > { %1603 = vmatprep.subr.bf16.mxu0 %v1602_v20  ;;  %1682 = vmatprep.subr.bf16.mxu1 %v1602_v20  ;;  %v542_v29 = vld [vmem:[%s2088_s17 + $0xa8] sm:$0xff]  ;;  %v1608_v30 = vpack.c.bf16 %v524_v27, %v523_v26  ;;  %v525_v32 = vld [vmem:[%s2088_s17 + $0x20] sm:$0xff]  ;;  %v543_v34 = vld [vmem:[%s2088_s17 + $0xb0] sm:$0xff] }
  0x4c   : > { %1605 = vmatpush3.bf16.msra.mxu0 %v1604_v24  ;;  %1690 = vmatpush3.bf16.msra.mxu1 %v1604_v24  ;;  %v1610_v31 = vpack.c.bf16 %v542_v29, %v541_v28  ;;  %v526_v33 = vld [vmem:[%s2088_s17 + $0x28] sm:$0xff]  ;;  %v544_v35 = vld [vmem:[%s2088_s17 + $0xb8] sm:$0xff]  ;;  %v527_v38 = vld [vmem:[%s2088_s17 + $0x30] sm:$0xff] }
  0x4d   : > { %1607 = vmatprep.subr.bf16.mxu0 %v1606_v25  ;;  %1683 = vmatprep.subr.bf16.mxu1 %v1606_v25  ;;  %v1612_v36 = vpack.c.bf16 %v526_v33, %v525_v32  ;;  %v1614_v37 = vpack.c.bf16 %v544_v35, %v543_v34  ;;  %v528_v39 = vld [vmem:[%s2088_s17 + $0x38] sm:$0xff]  ;;  %v545_v40 = vld [vmem:[%s2088_s17 + $0xc0] sm:$0xff]  ;;  %v546_v41 = vld [vmem:[%s2088_s17 + $0xc8] sm:$0xff] }
  0x4e   : > { %v473_v42 = vld [vmem:[%s2095_s13] sm:$0xff]  ;;  %v1616_v45 = vpack.c.bf16 %v528_v39, %v527_v38  ;;  %v1618_v47 = vpack.c.bf16 %v546_v41, %v545_v40  ;;  %v530_v49 = vld [vmem:[%s2088_s17 + $0x48] sm:$0xff]  ;;  %v547_v50 = vld [vmem:[%s2088_s17 + $0xd0] sm:$0xff] }
  0x4f   : > { %v490_v43 = vunpack.c.h.bf16 %v473_v42  ;;  %v481_v44 = vld [vmem:[%s2095_s13 + $0x40] sm:$0xff]  ;;  %v548_v51 = vld [vmem:[%s2088_s17 + $0xd8] sm:$0xff]  ;;  %v531_v54 = vld [vmem:[%s2088_s17 + $0x50] sm:$0xff]  ;;  %v489_v7 = vunpack.c.l.bf16 %v473_v42 }
  0x50   : > { %1609 = vmatpush3.bf16.msra.mxu0 %v1608_v30  ;;  %1691 = vmatpush3.bf16.msra.mxu1 %v1608_v30  ;;  %v506_v46 = vunpack.c.h.bf16 %v481_v44  ;;  %v529_v48 = vld [vmem:[%s2088_s17 + $0x40] sm:$0xff]  ;;  %v1622_v53 = vpack.c.bf16 %v548_v51, %v547_v50  ;;  %v532_v55 = vld [vmem:[%s2088_s17 + $0x58] sm:$0xff]  ;;  %v550_v57 = vld [vmem:[%s2088_s17 + $0xe8] sm:$0xff]  ;;  %v505_v8 = vunpack.c.l.bf16 %v481_v44 }
  0x51   : > { %1611 = vmatprep.subr.bf16.mxu0 %v1610_v31  ;;  %1684 = vmatprep.subr.bf16.mxu1 %v1610_v31  ;;  %v1620_v52 = vpack.c.bf16 %v530_v49, %v529_v48  ;;  %v549_v56 = vld [vmem:[%s2088_s17 + $0xe0] sm:$0xff]  ;;  %v1624_v58 = vpack.c.bf16 %v532_v55, %v531_v54  ;;  %v534_v61 = vld [vmem:[%s2088_s17 + $0x68] sm:$0xff]  ;;  %v551_v62 = vld [vmem:[%s2088_s17 + $0xf0] sm:$0xff] }
  0x52   : > { %617 = vmatprep.mubr.f32.mxu0 %v490_v43  ;;  %657 = vmatprep.mubr.f32.mxu1 %v506_v46  ;;  %v1626_v59 = vpack.c.bf16 %v550_v57, %v549_v56  ;;  %v533_v60 = vld [vmem:[%s2088_s17 + $0x60] sm:$0xff]  ;;  %v552_v63 = vld [vmem:[%s2088_s17 + $0xf8] sm:$0xff]  ;;  %v535_v2 = vld [vmem:[%s2088_s17 + $0x70] sm:$0xff] }
  0x53   : > { %v1628_v0 = vpack.c.bf16 %v534_v61, %v533_v60  ;;  %v1630_v1 = vpack.c.bf16 %v552_v63, %v551_v62  ;;  %v536_v3 = vld [vmem:[%s2088_s17 + $0x78] sm:$0xff]  ;;  %v474_v5 = vld [vmem:[%s2095_s13 + $0x8] sm:$0xff]  ;;  %v475_v11 = vld [vmem:[%s2095_s13 + $0x10] sm:$0xff] }
  0x54   : > { %1613 = vmatpush3.bf16.msra.mxu0 %v1612_v36  ;;  %1692 = vmatpush3.bf16.msra.mxu1 %v1612_v36  ;;  %v1632_v4 = vpack.c.bf16 %v536_v3, %v535_v2  ;;  %v482_v6 = vld [vmem:[%s2095_s13 + $0x48] sm:$0xff]  ;;  %v492_v9 = vunpack.c.h.bf16 %v474_v5  ;;  %v483_v12 = vld [vmem:[%s2095_s13 + $0x50] sm:$0xff]  ;;  %v491_v13 = vunpack.c.l.bf16 %v474_v5  ;;  %v494_v15 = vunpack.c.h.bf16 %v475_v11  ;;  %v476_v17 = vld [vmem:[%s2095_s13 + $0x18] sm:$0xff] }
  0x55   : > { %1615 = vmatprep.subr.bf16.mxu0 %v1614_v37  ;;  %1685 = vmatprep.subr.bf16.mxu1 %v1614_v37  ;;  %v508_v10 = vunpack.c.h.bf16 %v482_v6  ;;  %v507_v14 = vunpack.c.l.bf16 %v482_v6  ;;  %v510_v16 = vunpack.c.h.bf16 %v483_v12  ;;  %v484_v18 = vld [vmem:[%s2095_s13 + $0x58] sm:$0xff]  ;;  %v493_v19 = vunpack.c.l.bf16 %v475_v11  ;;  %v477_v23 = vld [vmem:[%s2095_s13 + $0x20] sm:$0xff]  ;;  %v478_v29 = vld [vmem:[%s2095_s13 + $0x28] sm:$0xff] }
  0x56   : > { %v509_v20 = vunpack.c.l.bf16 %v483_v12  ;;  %v496_v21 = vunpack.c.h.bf16 %v476_v17  ;;  %v512_v22 = vunpack.c.h.bf16 %v484_v18  ;;  %v485_v24 = vld [vmem:[%s2095_s13 + $0x60] sm:$0xff]  ;;  %v495_v25 = vunpack.c.l.bf16 %v476_v17  ;;  %v486_v30 = vld [vmem:[%s2095_s13 + $0x68] sm:$0xff]  ;;  %v479_v35 = vld [vmem:[%s2095_s13 + $0x30] sm:$0xff] }
  0x57   : > { %v511_v26 = vunpack.c.l.bf16 %v484_v18  ;;  %v498_v27 = vunpack.c.h.bf16 %v477_v23  ;;  %v514_v28 = vunpack.c.h.bf16 %v485_v24  ;;  %v497_v31 = vunpack.c.l.bf16 %v477_v23  ;;  %v487_v36 = vld [vmem:[%s2095_s13 + $0x70] sm:$0xff]  ;;  %v480_v41 = vld [vmem:[%s2095_s13 + $0x38] sm:$0xff]  ;;  %v457_v51 = vld [vmem:[#allocation2] sm:$0xff] }
  0x58   : > { %1617 = vmatpush3.bf16.msra.mxu0 %v1616_v45  ;;  %1693 = vmatpush3.bf16.msra.mxu1 %v1616_v45  ;;  %v513_v32 = vunpack.c.l.bf16 %v485_v24  ;;  %v500_v33 = vunpack.c.h.bf16 %v478_v29  ;;  %v516_v34 = vunpack.c.h.bf16 %v486_v30  ;;  %v499_v37 = vunpack.c.l.bf16 %v478_v29  ;;  %v488_v42 = vld [vmem:[%s2095_s13 + $0x78] sm:$0xff]  ;;  %v458_v61 = vld [vmem:[#allocation2 + $0x8] sm:$0xff]  ;;  %v469_v29 = vld [vmem:[#allocation2 + $0x60] sm:$0xff] }
  0x59   : > { %1619 = vmatprep.subr.bf16.mxu0 %v1618_v47  ;;  %1686 = vmatprep.subr.bf16.mxu1 %v1618_v47  ;;  %v515_v38 = vunpack.c.l.bf16 %v486_v30  ;;  %v502_v39 = vunpack.c.h.bf16 %v479_v35  ;;  %v518_v40 = vunpack.c.h.bf16 %v487_v36  ;;  %v501_v43 = vunpack.c.l.bf16 %v479_v35  ;;  %v466_v63 = vld [vmem:[#allocation2 + $0x48] sm:$0xff]  ;;  %v460_v17 = vld [vmem:[#allocation2 + $0x18] sm:$0xff] }
  0x5a   : > { %v517_v44 = vunpack.c.l.bf16 %v487_v36  ;;  %v504_v45 = vunpack.c.h.bf16 %v480_v41  ;;  %v520_v46 = vunpack.c.h.bf16 %v488_v42  ;;  %v503_v47 = vunpack.c.l.bf16 %v480_v41 }
  0x5b   : > { %v519_v48 = vunpack.c.l.bf16 %v488_v42 }
  0x5c   : > { %1621 = vmatpush3.bf16.msra.mxu0 %v1620_v52  ;;  %1694 = vmatpush3.bf16.msra.mxu1 %v1620_v52 }
  0x5d   : > { %1623 = vmatprep.subr.bf16.mxu0 %v1622_v53  ;;  %1687 = vmatprep.subr.bf16.mxu1 %v1622_v53  ;;  %v465_v53 = vld [vmem:[#allocation2 + $0x40] sm:$0xff] }
  0x60   : > { %1625 = vmatpush3.bf16.msra.mxu0 %v1624_v58  ;;  %1695 = vmatpush3.bf16.msra.mxu1 %v1624_v58 }
  0x61   : > { %1627 = vmatprep.subr.bf16.mxu0 %v1626_v59  ;;  %1688 = vmatprep.subr.bf16.mxu1 %v1626_v59 }
  0x64   : > { %1629 = vmatpush3.bf16.msra.mxu0 %v1628_v0  ;;  %1696 = vmatpush3.bf16.msra.mxu1 %v1628_v0 }
  0x65   : > { %1631 = vmatprep.subr.bf16.mxu0 %v1630_v1  ;;  %1689 = vmatprep.subr.bf16.mxu1 %v1630_v1 }
  0x68   : > { %1633 = vmatpush3.bf16.msra.mxu0 %v1632_v4  ;;  %1697 = vmatpush3.bf16.msra.mxu1 %v1632_v4 }
  0x6b   : > { %618 = vmatmul.mubr.f32.vlgmr.msra.gmra.mrb[0].mxu0 %v489_v7  ;;  %658 = vmatmul.mubr.f32.vlgmr.msra.gmra.mrb[0].mxu1 %v505_v8  ;;  %v459_v7 = vld [vmem:[#allocation2 + $0x10] sm:$0xff] }
  0x6c   : > { %622 = vmatprep.mubr.f32.mxu0 %v492_v9  ;;  %662 = vmatprep.mubr.f32.mxu1 %v508_v10  ;;  %v467_v9 = vld [vmem:[#allocation2 + $0x50] sm:$0xff] }
  0x6f   : > { %623 = vmatmul.mubr.f32.gmra.mrb[2].mxu0 %v491_v13  ;;  %663 = vmatmul.mubr.f32.gmra.mrb[2].mxu1 %v507_v14 }
  0x70   : > { %627 = vmatprep.mubr.f32.mxu0 %v494_v15  ;;  %667 = vmatprep.mubr.f32.mxu1 %v510_v16 }
  0x73   : > { %628 = vmatmul.mubr.f32.gmra.mrb[4].mxu0 %v493_v19  ;;  %668 = vmatmul.mubr.f32.gmra.mrb[4].mxu1 %v509_v20  ;;  %v468_v19 = vld [vmem:[#allocation2 + $0x58] sm:$0xff] }
  0x74   : > { %632 = vmatprep.mubr.f32.mxu0 %v496_v21  ;;  %672 = vmatprep.mubr.f32.mxu1 %v512_v22 }
  0x77   : > { %633 = vmatmul.mubr.f32.gmra.mrb[6].mxu0 %v495_v25  ;;  %673 = vmatmul.mubr.f32.gmra.mrb[6].mxu1 %v511_v26 }
  0x78   : > { %637 = vmatprep.mubr.f32.mxu0 %v498_v27  ;;  %677 = vmatprep.mubr.f32.mxu1 %v514_v28  ;;  %v461_v27 = vld [vmem:[#allocation2 + $0x20] sm:$0xff] }
  0x7b   : > { %638 = vmatmul.mubr.f32.gmra.mrb[8].mxu0 %v497_v31  ;;  %678 = vmatmul.mubr.f32.gmra.mrb[8].mxu1 %v513_v32 }
  0x7c   : > { %642 = vmatprep.mubr.f32.mxu0 %v500_v33  ;;  %682 = vmatprep.mubr.f32.mxu1 %v516_v34 }
  0x7f   : > { %643 = vmatmul.mubr.f32.gmra.mrb[10].mxu0 %v499_v37  ;;  %683 = vmatmul.mubr.f32.gmra.mrb[10].mxu1 %v515_v38  ;;  %v462_v37 = vld [vmem:[#allocation2 + $0x28] sm:$0xff] }
  0x80   : > { %647 = vmatprep.mubr.f32.mxu0 %v502_v39  ;;  %687 = vmatprep.mubr.f32.mxu1 %v518_v40  ;;  %v470_v39 = vld [vmem:[#allocation2 + $0x68] sm:$0xff] }
  0x83   : > { %648 = vmatmul.mubr.f32.gmra.mrb[12].mxu0 %v501_v43  ;;  %688 = vmatmul.mubr.f32.gmra.mrb[12].mxu1 %v517_v44 }
  0x84   : > { %652 = vmatprep.mubr.f32.mxu0 %v504_v45  ;;  %692 = vmatprep.mubr.f32.mxu1 %v520_v46 }
  0x87   : > { %653 = vmatmul.mubr.f32.gmra.mrb[14].mxu0 %v503_v47  ;;  %693 = vmatmul.mubr.f32.gmra.mrb[14].mxu1 %v519_v48  ;;  %v463_v47 = vld [vmem:[#allocation2 + $0x30] sm:$0xff] }
 0x13e   : > { %v1402_v49 = vpop.f32.mrb[0].mxu0  ;;  %v1426_v50 = vpop.f32.mrb[0].mxu1 }
 0x13f   : > { %v1403_v52 = vpop.f32.mrb[1].mxu0  ;;  %v1427_v54 = vpop.f32.mrb[1].mxu1 }
 0x140   : > { %v1404_v55 = vadd.f32 %v1403_v52, %v1402_v49  ;;  %v1428_v56 = vadd.f32 %v1427_v54, %v1426_v50  ;;  %v471_v49 = vld [vmem:[#allocation2 + $0x70] sm:$0xff] }
 0x142   : > { %v698_v57 = vadd.f32 %v1404_v55, %v457_v51  ;;  %v706_v58 = vadd.f32 %v1428_v56, %v465_v53  ;;  %v1405_v59 = vpop.f32.mrb[2].mxu0  ;;  %v1429_v60 = vpop.f32.mrb[2].mxu1 }
 0x143   : > { %v1406_v62 = vpop.f32.mrb[3].mxu0  ;;  %v1430_v0 = vpop.f32.mrb[3].mxu1 }
 0x144   : > { %715 = vst.msk [vmem:[#allocation2] sm:$0xff] %vm714_vm1, %v698_v57  ;;  %723 = vst.msk [vmem:[#allocation2 + $0x40] sm:$0xff] %vm714_vm1, %v706_v58  ;;  %v1407_v1 = vadd.f32 %v1406_v62, %v1405_v59  ;;  %v1431_v2 = vadd.f32 %v1430_v0, %v1429_v60  ;;  %v464_v57 = vld [vmem:[#allocation2 + $0x38] sm:$0xff] }
 0x145   : > { %v472_v59 = vld [vmem:[#allocation2 + $0x78] sm:$0xff] }
 0x146   : > { %v699_v3 = vadd.f32 %v1407_v1, %v458_v61  ;;  %v707_v4 = vadd.f32 %v1431_v2, %v466_v63  ;;  %v1408_v5 = vpop.f32.mrb[4].mxu0  ;;  %v1432_v6 = vpop.f32.mrb[4].mxu1  ;;  %v799_v1 = vld [vmem:[%s2379_s3] sm:$0xff] (!%p1344_p6)  ;;  %v800_v2 = vld [vmem:[%s2379_s3 + $0x8] sm:$0xff] (!%p1344_p6) }
 0x147   : > { %v1409_v8 = vpop.f32.mrb[5].mxu0  ;;  %v1433_v10 = vpop.f32.mrb[5].mxu1 }
 0x148   : > { %716 = vst.msk [vmem:[#allocation2 + $0x8] sm:$0xff] %vm714_vm1, %v699_v3  ;;  %724 = vst.msk [vmem:[#allocation2 + $0x48] sm:$0xff] %vm714_vm1, %v707_v4  ;;  %v1410_v11 = vadd.f32 %v1409_v8, %v1408_v5  ;;  %v1434_v12 = vadd.f32 %v1433_v10, %v1432_v6  ;;  %v801_v3 = vld [vmem:[%s2379_s3 + $0x10] sm:$0xff] (!%p1344_p6)  ;;  %v1634_v4 = vpack.c.bf16 (!%p1344_p6), %v800_v2, %v799_v1  ;;  %v802_v5 = vld [vmem:[%s2379_s3 + $0x18] sm:$0xff] (!%p1344_p6) }
 0x149   : > { %v1638_v6 = vpack.c.bf16 (!%p1344_p6), %v802_v5, %v801_v3  ;;  %v804_v8 = vld [vmem:[%s2379_s3 + $0x28] sm:$0xff] (!%p1344_p6)  ;;  %v745_v3 = vld [vmem:[%s2093_s27 + $0x50] sm:$0xff] (!%p1344_p6) }
 0x14a   : > { %v700_v13 = vadd.f32 %v1410_v11, %v459_v7  ;;  %v708_v14 = vadd.f32 %v1434_v12, %v467_v9  ;;  %v1411_v15 = vpop.f32.mrb[6].mxu0  ;;  %v1435_v16 = vpop.f32.mrb[6].mxu1  ;;  %v803_v7 = vld [vmem:[%s2379_s3 + $0x20] sm:$0xff] (!%p1344_p6)  ;;  %1635 = vmatprep.subr.bf16.mxu0 (!%p1344_p6), %v1634_v4  ;;  %v744_v2 = vld [vmem:[%s2093_s27 + $0x48] sm:$0xff] (!%p1344_p6) }
 0x14b   : > { %v1412_v18 = vpop.f32.mrb[7].mxu0  ;;  %v1436_v20 = vpop.f32.mrb[7].mxu1  ;;  %v735_v9 = vld [vmem:[%s2093_s27] sm:$0xff] (!%p1344_p6)  ;;  %1637 = vmatpush3.bf16.msra.mxu0 (!%p1344_p6), %v1634_v4  ;;  %v1642_v12 = vpack.c.bf16 (!%p1344_p6), %v804_v8, %v803_v7  ;;  %v1033_v8 = vld [vmem:[%s2381_s5 + $0x50] sm:$0xff] (!%p1344_p6) }
 0x14c   : > { %717 = vst.msk [vmem:[#allocation2 + $0x10] sm:$0xff] %vm714_vm1, %v700_v13  ;;  %725 = vst.msk [vmem:[#allocation2 + $0x50] sm:$0xff] %vm714_vm1, %v708_v14  ;;  %v1413_v21 = vadd.f32 %v1412_v18, %v1411_v15  ;;  %v1437_v22 = vadd.f32 %v1436_v20, %v1435_v16  ;;  %v751_v10 = vld [vmem:[#allocation2] sm:$0xff] (!%p1344_p6)  ;;  %1639 = vmatprep.subr.bf16.mxu0 (!%p1344_p6), %v1638_v6  ;;  %v805_v13 = vld [vmem:[%s2379_s3 + $0x30] sm:$0xff] (!%p1344_p6) }
 0x14d   : > { %v767_v11 = vmul.f32 (!%p1344_p6), 1.25, %v751_v10  ;;  %v806_v14 = vld [vmem:[%s2379_s3 + $0x38] sm:$0xff] (!%p1344_p6)  ;;  %v736_v20 = vld [vmem:[%s2093_s27 + $0x8] sm:$0xff] (!%p1344_p6) }
 0x14e   : > { %v701_v23 = vadd.f32 %v1413_v21, %v460_v17  ;;  %v709_v24 = vadd.f32 %v1437_v22, %v468_v19  ;;  %v1414_v25 = vpop.f32.mrb[8].mxu0  ;;  %v1438_v26 = vpop.f32.mrb[8].mxu1  ;;  %v1646_v17 = vpack.c.bf16 (!%p1344_p6), %v806_v14, %v805_v13  ;;  %v737_v21 = vld [vmem:[%s2093_s27 + $0x10] sm:$0xff] (!%p1344_p6)  ;;  %v746_v13 = vld [vmem:[%s2093_s27 + $0x58] sm:$0xff] (!%p1344_p6)  ;;  %v747_v14 = vld [vmem:[%s2093_s27 + $0x60] sm:$0xff] (!%p1344_p6) }
 0x14f   : > { %v1415_v28 = vpop.f32.mrb[9].mxu0  ;;  %v1439_v30 = vpop.f32.mrb[9].mxu1  ;;  %v783_v15 = vadd.f32 (!%p1344_p6), %v767_v11, %v735_v9  ;;  %1641 = vmatpush3.bf16.msra.mxu0 (!%p1344_p6), %v1638_v6  ;;  %v752_v16 = vld [vmem:[#allocation2 + $0x8] sm:$0xff] (!%p1344_p6)  ;;  %v1034_v9 = vld [vmem:[%s2381_s5 + $0x58] sm:$0xff] (!%p1344_p6) }
 0x150   : > { %718 = vst.msk [vmem:[#allocation2 + $0x18] sm:$0xff] %vm714_vm1, %v701_v23  ;;  %726 = vst.msk [vmem:[#allocation2 + $0x58] sm:$0xff] %vm714_vm1, %v709_v24  ;;  %v1416_v31 = vadd.f32 %v1415_v28, %v1414_v25  ;;  %v1440_v32 = vadd.f32 %v1439_v30, %v1438_v26  ;;  %1643 = vmatprep.subr.bf16.mxu0 (!%p1344_p6), %v1642_v12  ;;  %v768_v19 = vmul.f32 (!%p1344_p6), 1.25, %v752_v16  ;;  %v1023_v25 = vld [vmem:[%s2381_s5] sm:$0xff] (!%p1344_p6)  ;;  %v1024_v26 = vld [vmem:[%s2381_s5 + $0x8] sm:$0xff] (!%p1344_p6) }
 0x151   : > { %1522 = vmatprep.mubr.msk.f32.mxu0 (!%p1344_p6), %vm714_vm1, %v783_v15  ;;  %v1025_v28 = vld [vmem:[%s2381_s5 + $0x10] sm:$0xff] (!%p1344_p6) }
 0x152   : > { %v702_v33 = vadd.f32 %v1416_v31, %v461_v27  ;;  %v710_v34 = vadd.f32 %v1440_v32, %v469_v29  ;;  %v1417_v35 = vpop.f32.mrb[10].mxu0  ;;  %v1441_v36 = vpop.f32.mrb[10].mxu1  ;;  %v1650_v27 = vpack.c.bf16 (!%p1344_p6), %v1024_v26, %v1023_v25  ;;  %v1026_v29 = vld [vmem:[%s2381_s5 + $0x18] sm:$0xff] (!%p1344_p6)  ;;  %v784_v30 = vadd.f32 (!%p1344_p6), %v768_v19, %v736_v20  ;;  %v1035_v19 = vld [vmem:[%s2381_s5 + $0x60] sm:$0xff] (!%p1344_p6)  ;;  %v1036_v20 = vld [vmem:[%s2381_s5 + $0x68] sm:$0xff] (!%p1344_p6) }
 0x153   : > { %v1418_v38 = vpop.f32.mrb[11].mxu0  ;;  %v1442_v40 = vpop.f32.mrb[11].mxu1  ;;  %v753_v18 = vld [vmem:[#allocation2 + $0x10] sm:$0xff] (!%p1344_p6)  ;;  %1645 = vmatpush3.bf16.msra.mxu0 (!%p1344_p6), %v1642_v12 }
 0x154   : > { %719 = vst.msk [vmem:[#allocation2 + $0x20] sm:$0xff] %vm714_vm1, %v702_v33  ;;  %727 = vst.msk [vmem:[#allocation2 + $0x60] sm:$0xff] %vm714_vm1, %v710_v34  ;;  %v1419_v41 = vadd.f32 %v1418_v38, %v1417_v35  ;;  %v1443_v42 = vadd.f32 %v1442_v40, %v1441_v36  ;;  %v769_v22 = vmul.f32 (!%p1344_p6), 1.25, %v753_v18  ;;  %1647 = vmatprep.subr.bf16.mxu0 (!%p1344_p6), %v1646_v17  ;;  %v738_v33 = vld [vmem:[%s2093_s27 + $0x18] sm:$0xff] (!%p1344_p6)  ;;  %v739_v34 = vld [vmem:[%s2093_s27 + $0x20] sm:$0xff] (!%p1344_p6)  ;;  %1698 = vmatprep.subr.bf16.mxu1 (!%p1344_p6), %v1650_v27 }
 0x155   : > { %v1028_v40 = vld [vmem:[%s2381_s5 + $0x28] sm:$0xff] (!%p1344_p6)  ;;  %1706 = vmatpush3.bf16.msra.mxu1 (!%p1344_p6), %v1650_v27 }
 0x156   : > { %v703_v43 = vadd.f32 %v1419_v41, %v462_v37  ;;  %v711_v44 = vadd.f32 %v1443_v42, %v470_v39  ;;  %v1420_v45 = vpop.f32.mrb[12].mxu0  ;;  %v1444_v46 = vpop.f32.mrb[12].mxu1  ;;  %v785_v32 = vadd.f32 (!%p1344_p6), %v769_v22, %v737_v21  ;;  %v1654_v37 = vpack.c.bf16 (!%p1344_p6), %v1026_v29, %v1025_v28  ;;  %v1027_v39 = vld [vmem:[%s2381_s5 + $0x20] sm:$0xff] (!%p1344_p6)  ;;  %v749_v28 = vld [vmem:[%s2093_s27 + $0x70] sm:$0xff] (!%p1344_p6) }
 0x157   : > { %v1421_v48 = vpop.f32.mrb[13].mxu0  ;;  %v1445_v50 = vpop.f32.mrb[13].mxu1  ;;  %v754_v23 = vld [vmem:[#allocation2 + $0x18] sm:$0xff] (!%p1344_p6)  ;;  %1649 = vmatpush3.bf16.msra.mxu0 (!%p1344_p6), %v1646_v17  ;;  %v1670_v17 = vpack.c.bf16 (!%p1344_p6), %v1034_v9, %v1033_v8 }
 0x158   : > { %720 = vst.msk [vmem:[#allocation2 + $0x28] sm:$0xff] %vm714_vm1, %v703_v43  ;;  %728 = vst.msk [vmem:[#allocation2 + $0x68] sm:$0xff] %vm714_vm1, %v711_v44  ;;  %v1422_v51 = vadd.f32 %v1421_v48, %v1420_v45  ;;  %v1446_v52 = vadd.f32 %v1445_v50, %v1444_v46  ;;  %v770_v31 = vmul.f32 (!%p1344_p6), 1.25, %v754_v23  ;;  %1651 = vmatprep.subr.bf16.mxu0 (!%p1344_p6), %v1650_v27  ;;  %1699 = vmatprep.subr.bf16.mxu1 (!%p1344_p6), %v1654_v37  ;;  %v740_v44 = vld [vmem:[%s2093_s27 + $0x28] sm:$0xff] (!%p1344_p6)  ;;  %v741_v45 = vld [vmem:[%s2093_s27 + $0x30] sm:$0xff] (!%p1344_p6) }
 0x159   : > { %v1658_v48 = vpack.c.bf16 (!%p1344_p6), %v1028_v40, %v1027_v39  ;;  %v1029_v50 = vld [vmem:[%s2381_s5 + $0x30] sm:$0xff] (!%p1344_p6)  ;;  %1707 = vmatpush3.bf16.msra.mxu1 (!%p1344_p6), %v1654_v37  ;;  %v762_v5 = vld [vmem:[#allocation2 + $0x58] sm:$0xff] (!%p1344_p6) }
 0x15a   : > { %v704_v53 = vadd.f32 %v1422_v51, %v463_v47  ;;  %v712_v54 = vadd.f32 %v1446_v52, %v471_v49  ;;  %v1423_v55 = vpop.f32.mrb[14].mxu0  ;;  %v1447_v56 = vpop.f32.mrb[14].mxu1  ;;  %734 = sbr.rel (%p1344_p6) target bundleno = 814 (0x32e), region = 94  ;;  %1523 = vmatmul.mubr.msk.f32.vlgmr.msra.gmra.mrb[0].mxu0 (!%p1344_p6), %vm714_vm1, %v784_v30  ;;  %v786_v41 = vadd.f32 (!%p1344_p6), %v770_v31, %v738_v33  ;;  %v759_v49 = vld [vmem:[#allocation2 + $0x40] sm:$0xff] (!%p1344_p6)  ;;  %v1030_v51 = vld [vmem:[%s2381_s5 + $0x38] sm:$0xff] (!%p1344_p6)  ;;  %v778_v11 = vmul.f32 (!%p1344_p6), 1.25, %v762_v5 }
 0x15b   : > { %v1424_v58 = vpop.f32.mrb[15].mxu0  ;;  %v1448_v60 = vpop.f32.mrb[15].mxu1  ;;  %v755_v24 = vld [vmem:[#allocation2 + $0x20] sm:$0xff] (!%p1344_p6)  ;;  %1525 = vmatprep.mubr.msk.f32.mxu0 (!%p1344_p6), %vm714_vm1, %v785_v32  ;;  %1653 = vmatpush3.bf16.msra.mxu0 (!%p1344_p6), %v1650_v27  ;;  %v1674_v27 = vpack.c.bf16 (!%p1344_p6), %v1036_v20, %v1035_v19  ;;  %v750_v32 = vld [vmem:[%s2093_s27 + $0x78] sm:$0xff] (!%p1344_p6) }
 0x15c   : > { %721 = vst.msk [vmem:[#allocation2 + $0x30] sm:$0xff] %vm714_vm1, %v704_v53  ;;  %729 = vst.msk [vmem:[#allocation2 + $0x70] sm:$0xff] %vm714_vm1, %v712_v54  ;;  %v1425_v61 = vadd.f32 %v1424_v58, %v1423_v55  ;;  %v1449_v62 = vadd.f32 %v1448_v60, %v1447_v56  ;;  %v771_v35 = vmul.f32 (!%p1344_p6), 1.25, %v755_v24  ;;  %1655 = vmatprep.subr.bf16.mxu0 (!%p1344_p6), %v1654_v37  ;;  %1700 = vmatprep.subr.bf16.mxu1 (!%p1344_p6), %v1658_v48  ;;  %v742_v55 = vld [vmem:[%s2093_s27 + $0x38] sm:$0xff] (!%p1344_p6)  ;;  %v743_v56 = vld [vmem:[%s2093_s27 + $0x40] sm:$0xff] (!%p1344_p6) }
 0x15d   : > { %v760_v58 = vld [vmem:[#allocation2 + $0x48] sm:$0xff] (!%p1344_p6)  ;;  %v761_v60 = vld [vmem:[#allocation2 + $0x50] sm:$0xff] (!%p1344_p6)  ;;  %1708 = vmatpush3.bf16.msra.mxu1 (!%p1344_p6), %v1658_v48  ;;  %v763_v7 = vld [vmem:[#allocation2 + $0x60] sm:$0xff] (!%p1344_p6)  ;;  %v794_v21 = vadd.f32 (!%p1344_p6), %v778_v11, %v746_v13 }
 0x15e   : > { %v705_v63 = vadd.f32 %v1425_v61, %v464_v57  ;;  %v713_v0 = vadd.f32 %v1449_v62, %v472_v59  ;;  %v787_v43 = vadd.f32 (!%p1344_p6), %v771_v35, %v739_v34  ;;  %1526 = vmatmul.mubr.msk.f32.gmra.mrb[2].mxu0 (!%p1344_p6), %vm714_vm1, %v786_v41  ;;  %v775_v57 = vmul.f32 (!%p1344_p6), 1.25, %v759_v49  ;;  %v1031_v61 = vld [vmem:[%s2381_s5 + $0x40] sm:$0xff] (!%p1344_p6)  ;;  %v1032_v62 = vld [vmem:[%s2381_s5 + $0x48] sm:$0xff] (!%p1344_p6)  ;;  %v1037_v34 = vld [vmem:[%s2381_s5 + $0x70] sm:$0xff] (!%p1344_p6) }
 0x15f   : > { %v756_v36 = vld [vmem:[#allocation2 + $0x28] sm:$0xff] (!%p1344_p6)  ;;  %1657 = vmatpush3.bf16.msra.mxu0 (!%p1344_p6), %v1654_v37  ;;  %v1662_v59 = vpack.c.bf16 (!%p1344_p6), %v1030_v51, %v1029_v50  ;;  %v777_v4 = vmul.f32 (!%p1344_p6), 1.25, %v761_v60  ;;  %v1666_v6 = vpack.c.bf16 (!%p1344_p6), %v1032_v62, %v1031_v61  ;;  %v779_v15 = vmul.f32 (!%p1344_p6), 1.25, %v763_v7  ;;  %v1038_v35 = vld [vmem:[%s2381_s5 + $0x78] sm:$0xff] (!%p1344_p6)  ;;  %v1345_v37 = vld [vmem:[%s2380_s4] ss:$0 sm:$0xff] (!%p1344_p6) }
 0x160   : > { %722 = vst.msk [vmem:[#allocation2 + $0x38] sm:$0xff] %vm714_vm1, %v705_v63  ;;  %730 = vst.msk [vmem:[#allocation2 + $0x78] sm:$0xff] %vm714_vm1, %v713_v0  ;;  %v772_v42 = vmul.f32 (!%p1344_p6), 1.25, %v756_v36  ;;  %1528 = vmatprep.mubr.msk.f32.mxu0 (!%p1344_p6), %vm714_vm1, %v787_v43  ;;  %1659 = vmatprep.subr.bf16.mxu0 (!%p1344_p6), %v1658_v48  ;;  %v776_v0 = vmul.f32 (!%p1344_p6), 1.25, %v760_v58  ;;  %v791_v1 = vadd.f32 (!%p1344_p6), %v775_v57, %v743_v56  ;;  %v764_v16 = vld [vmem:[#allocation2 + $0x68] sm:$0xff] (!%p1344_p6) }
 0x161   : > { %1701 = vmatprep.subr.bf16.mxu1 %v1662_v59  ;;  %v793_v12 = vadd.f32 %v777_v4, %v745_v3  ;;  %v780_v22 = vmul.f32 1.25, %v764_v16  ;;  %v795_v23 = vadd.f32 %v779_v15, %v747_v14  ;;  %v748_v24 = vld [vmem:[%s2093_s27 + $0x68] sm:$0xff]  ;;  %v1678_v36 = vpack.c.bf16 %v1038_v35, %v1037_v34 }
 0x162   : > { %v788_v52 = vadd.f32 %v772_v42, %v740_v44  ;;  %1709 = vmatpush3.bf16.msra.mxu1 %v1662_v59  ;;  %v792_v10 = vadd.f32 %v776_v0, %v744_v2 }
 0x163   : > { %v757_v38 = vld [vmem:[#allocation2 + $0x30] sm:$0xff]  ;;  %1661 = vmatpush3.bf16.msra.mxu0 %v1658_v48  ;;  %1702 = vmatprep.subr.bf16.mxu1 %v1666_v6  ;;  %v796_v29 = vadd.f32 %v780_v22, %v748_v24  ;;  %v1362_v22 = vld [vmem:[%s2382_s6] ss:$0 sm:$0xff] }
 0x164   : > { %v773_v46 = vmul.f32 1.25, %v757_v38  ;;  %1529 = vmatmul.mubr.msk.f32.gmra.mrb[4].mxu0 %vm714_vm1, %v788_v52  ;;  %1663 = vmatprep.subr.bf16.mxu0 %v1662_v59  ;;  %v765_v18 = vld [vmem:[#allocation2 + $0x70] sm:$0xff] }
 0x165   : > { %v781_v25 = vmul.f32 1.25, %v765_v18 }
 0x166   : > { %v789_v54 = vadd.f32 %v773_v46, %v741_v45  ;;  %1710 = vmatpush3.bf16.msra.mxu1 %v1666_v6 }
 0x167   : > { %v758_v47 = vld [vmem:[#allocation2 + $0x38] sm:$0xff]  ;;  %1665 = vmatpush3.bf16.msra.mxu0 %v1662_v59  ;;  %1703 = vmatprep.subr.bf16.mxu1 %v1670_v17  ;;  %v797_v31 = vadd.f32 %v781_v25, %v749_v28 }
 0x168   : > { %v774_v53 = vmul.f32 1.25, %v758_v47  ;;  %1531 = vmatprep.mubr.msk.f32.mxu0 %vm714_vm1, %v789_v54  ;;  %1667 = vmatprep.subr.bf16.mxu0 %v1666_v6  ;;  %v766_v26 = vld [vmem:[#allocation2 + $0x78] sm:$0xff] }
 0x169   : > { %v782_v30 = vmul.f32 1.25, %v766_v26 }
 0x16a   : > { %v790_v63 = vadd.f32 %v774_v53, %v742_v55  ;;  %1711 = vmatpush3.bf16.msra.mxu1 %v1670_v17 }
 0x16b   : > { %1669 = vmatpush3.bf16.msra.mxu0 %v1666_v6  ;;  %1704 = vmatprep.subr.bf16.mxu1 %v1674_v27  ;;  %v798_v33 = vadd.f32 %v782_v30, %v750_v32 }
 0x16c   : > { %1532 = vmatmul.mubr.msk.f32.gmra.mrb[6].mxu0 %vm714_vm1, %v790_v63  ;;  %1671 = vmatprep.subr.bf16.mxu0 %v1670_v17 }
 0x16d   : > { %1534 = vmatprep.mubr.msk.f32.mxu0 %vm714_vm1, %v791_v1 }
 0x16e   : > { %1712 = vmatpush3.bf16.msra.mxu1 %v1674_v27 }
 0x16f   : > { %1673 = vmatpush3.bf16.msra.mxu0 %v1670_v17  ;;  %1705 = vmatprep.subr.bf16.mxu1 %v1678_v36 }
 0x170   : > { %1535 = vmatmul.mubr.msk.f32.gmra.mrb[8].mxu0 %vm714_vm1, %v792_v10  ;;  %1675 = vmatprep.subr.bf16.mxu0 %v1674_v27 }
 0x171   : > { %1537 = vmatprep.mubr.msk.f32.mxu0 %vm714_vm1, %v793_v12 }
 0x172   : > { %1713 = vmatpush3.bf16.msra.mxu1 %v1678_v36 }
 0x173   : > { %1677 = vmatpush3.bf16.msra.mxu0 %v1674_v27 }
 0x174   : > { %1538 = vmatmul.mubr.msk.f32.gmra.mrb[10].mxu0 %vm714_vm1, %v794_v21  ;;  %1679 = vmatprep.subr.bf16.mxu0 %v1678_v36 }
 0x175   : > { %1540 = vmatprep.mubr.msk.f32.mxu0 %vm714_vm1, %v795_v23 }
 0x177   : > { %1681 = vmatpush3.bf16.msra.mxu0 %v1678_v36 }
 0x178   : > { %1541 = vmatmul.mubr.msk.f32.gmra.mrb[12].mxu0 %vm714_vm1, %v796_v29 }
 0x179   : > { %1543 = vmatprep.mubr.msk.f32.mxu0 %vm714_vm1, %v797_v31 }
 0x17c   : > { %1544 = vmatmul.mubr.msk.f32.gmra.mrb[14].mxu0 %vm714_vm1, %v798_v33 }
 0x22d   : > { %v1524_v38 = vpop.f32.mrb[0].mxu0 }
 0x22e   : > { %v934_v39 = vadd.f32 %v1524_v38, %v1345_v37  ;;  %v928_v40 = vpop.f32.mrb[1].mxu0 }
 0x22f   : > { %v929_v41 = vadd.f32 %v1345_v37, %v928_v40 }
 0x230   : > { %v1008_v44 = vmax.f32 %v934_v39, 0.0 }
 0x231   : > { %v1007_v42 = vmax.f32 %v929_v41, 0.0  ;;  %v1527_v43 = vpop.f32.mrb[2].mxu0 }
 0x232   : > { %v944_v45 = vadd.f32 %v1527_v43, %v1345_v37  ;;  %v938_v46 = vpop.f32.mrb[3].mxu0 }
 0x233   : > { %v939_v47 = vadd.f32 %v1345_v37, %v938_v46  ;;  %1578 = vmatprep.mubr.f32.mxu0 %v1007_v42 }
 0x234   : > { %1579 = vmatmul.mubr.f32.vlgmr.msra.gmra.mrb[16].mxu0 %v1008_v44  ;;  %v1010_v50 = vmax.f32 %v944_v45, 0.0 }
 0x235   : > { %v1009_v48 = vmax.f32 %v939_v47, 0.0 }
 0x237   : > { %v1530_v49 = vpop.f32.mrb[4].mxu0  ;;  %1581 = vmatprep.mubr.f32.mxu0 %v1009_v48 }
 0x238   : > { %v954_v51 = vadd.f32 %v1530_v49, %v1345_v37  ;;  %v948_v52 = vpop.f32.mrb[5].mxu0  ;;  %1582 = vmatmul.mubr.f32.gmra.mrb[18].mxu0 %v1010_v50 }
 0x239   : > { %v949_v53 = vadd.f32 %v1345_v37, %v948_v52 }
 0x23a   : > { %v1012_v56 = vmax.f32 %v954_v51, 0.0 }
 0x23b   : > { %v1011_v55 = vmax.f32 %v949_v53, 0.0 }
 0x23d   : > { %1584 = vmatprep.mubr.f32.mxu1 %v1011_v55 }
 0x23e   : > { %1585 = vmatmul.mubr.f32.vlgmr.msra.gmra.mrb[0].mxu1 %v1012_v56 }
 0x23f   : > { %v1533_v54 = vpop.f32.mrb[6].mxu0 }
 0x240   : > { %v964_v57 = vadd.f32 %v1533_v54, %v1345_v37  ;;  %v958_v58 = vpop.f32.mrb[7].mxu0 }
 0x241   : > { %v959_v59 = vadd.f32 %v1345_v37, %v958_v58 }
 0x242   : > { %v1014_v62 = vmax.f32 %v964_v57, 0.0 }
 0x243   : > { %v1013_v60 = vmax.f32 %v959_v59, 0.0  ;;  %v1536_v61 = vpop.f32.mrb[8].mxu0 }
 0x244   : > { %v974_v63 = vadd.f32 %v1536_v61, %v1345_v37  ;;  %v968_v0 = vpop.f32.mrb[9].mxu0 }
 0x245   : > { %v969_v1 = vadd.f32 %v1345_v37, %v968_v0  ;;  %1587 = vmatprep.mubr.f32.mxu1 %v1013_v60 }
 0x246   : > { %1588 = vmatmul.mubr.f32.gmra.mrb[2].mxu1 %v1014_v62  ;;  %v1016_v4 = vmax.f32 %v974_v63, 0.0 }
 0x247   : > { %v1015_v2 = vmax.f32 %v969_v1, 0.0  ;;  %v1539_v3 = vpop.f32.mrb[10].mxu0 }
 0x248   : > { %v984_v5 = vadd.f32 %v1539_v3, %v1345_v37  ;;  %v978_v6 = vpop.f32.mrb[11].mxu0 }
 0x249   : > { %v979_v7 = vadd.f32 %v1345_v37, %v978_v6  ;;  %1590 = vmatprep.mubr.f32.mxu1 %v1015_v2 }
 0x24a   : > { %1591 = vmatmul.mubr.f32.gmra.mrb[4].mxu1 %v1016_v4  ;;  %v1018_v10 = vmax.f32 %v984_v5, 0.0 }
 0x24b   : > { %v1017_v8 = vmax.f32 %v979_v7, 0.0  ;;  %v1542_v9 = vpop.f32.mrb[12].mxu0 }
 0x24c   : > { %v994_v11 = vadd.f32 %v1542_v9, %v1345_v37  ;;  %v988_v12 = vpop.f32.mrb[13].mxu0 }
 0x24d   : > { %v989_v13 = vadd.f32 %v1345_v37, %v988_v12  ;;  %1593 = vmatprep.mubr.f32.mxu1 %v1017_v8 }
 0x24e   : > { %1594 = vmatmul.mubr.f32.gmra.mrb[6].mxu1 %v1018_v10  ;;  %v1020_v16 = vmax.f32 %v994_v11, 0.0 }
 0x24f   : > { %v1019_v14 = vmax.f32 %v989_v13, 0.0  ;;  %v1545_v15 = vpop.f32.mrb[14].mxu0 }
 0x250   : > { %v1004_v17 = vadd.f32 %v1545_v15, %v1345_v37  ;;  %v998_v18 = vpop.f32.mrb[15].mxu0 }
 0x251   : > { %v999_v19 = vadd.f32 %v1345_v37, %v998_v18  ;;  %1596 = vmatprep.mubr.f32.mxu1 %v1019_v14 }
 0x252   : > { %1597 = vmatmul.mubr.f32.gmra.mrb[8].mxu1 %v1020_v16  ;;  %v1022_v21 = vmax.f32 %v1004_v17, 0.0 }
 0x253   : > { %v1021_v20 = vmax.f32 %v999_v19, 0.0 }
 0x255   : > { %1599 = vmatprep.mubr.f32.mxu1 %v1021_v20 }
 0x256   : > { %1600 = vmatmul.mubr.f32.gmra.mrb[10].mxu1 %v1022_v21 }
 0x307   : > { %v1580_v23 = vpop.f32.mrb[16].mxu0 }
 0x308   : > { %v1118_v24 = vadd.f32 %v1580_v23, %v1362_v22  ;;  %v1112_v25 = vpop.f32.mrb[17].mxu0 }
 0x309   : > { %v1113_v26 = vadd.f32 %v1362_v22, %v1112_v25 }
 0x30a   : > { %1192 = vst [vmem:[%s2097_s14 + $0x8] sm:$0xff] %v1118_v24 }
 0x30b   : > { %1191 = vst [vmem:[%s2097_s14] sm:$0xff] %v1113_v26  ;;  %v1583_v27 = vpop.f32.mrb[18].mxu0 }
 0x30c   : > { %v1128_v28 = vadd.f32 %v1583_v27, %v1362_v22  ;;  %v1122_v29 = vpop.f32.mrb[19].mxu0 }
 0x30d   : > { %v1123_v30 = vadd.f32 %v1362_v22, %v1122_v29 }
 0x30e   : > { %1194 = vst [vmem:[%s2097_s14 + $0x18] sm:$0xff] %v1128_v28 }
 0x30f   : > { %1193 = vst [vmem:[%s2097_s14 + $0x10] sm:$0xff] %v1123_v30 }
 0x311   : > { %v1586_v31 = vpop.f32.mrb[0].mxu1 }
 0x312   : > { %v1138_v32 = vadd.f32 %v1586_v31, %v1362_v22  ;;  %v1132_v33 = vpop.f32.mrb[1].mxu1 }
 0x313   : > { %v1133_v34 = vadd.f32 %v1362_v22, %v1132_v33 }
 0x314   : > { %1196 = vst [vmem:[%s2097_s14 + $0x28] sm:$0xff] %v1138_v32 }
 0x315   : > { %1195 = vst [vmem:[%s2097_s14 + $0x20] sm:$0xff] %v1133_v34 }
 0x319   : > { %v1589_v35 = vpop.f32.mrb[2].mxu1 }
 0x31a   : > { %v1148_v36 = vadd.f32 %v1589_v35, %v1362_v22  ;;  %v1142_v37 = vpop.f32.mrb[3].mxu1 }
 0x31b   : > { %v1143_v38 = vadd.f32 %v1362_v22, %v1142_v37 }
 0x31c   : > { %1198 = vst [vmem:[%s2097_s14 + $0x38] sm:$0xff] %v1148_v36 }
 0x31d   : > { %1197 = vst [vmem:[%s2097_s14 + $0x30] sm:$0xff] %v1143_v38  ;;  %v1592_v39 = vpop.f32.mrb[4].mxu1 }
 0x31e   : > { %v1158_v40 = vadd.f32 %v1592_v39, %v1362_v22  ;;  %v1152_v41 = vpop.f32.mrb[5].mxu1 }
 0x31f   : > { %v1153_v42 = vadd.f32 %v1362_v22, %v1152_v41 }
 0x320   : > { %1200 = vst [vmem:[%s2097_s14 + $0x48] sm:$0xff] %v1158_v40 }
 0x321   : > { %1199 = vst [vmem:[%s2097_s14 + $0x40] sm:$0xff] %v1153_v42  ;;  %v1595_v43 = vpop.f32.mrb[6].mxu1 }
 0x322   : > { %v1168_v44 = vadd.f32 %v1595_v43, %v1362_v22  ;;  %v1162_v45 = vpop.f32.mrb[7].mxu1 }
 0x323   : > { %v1163_v46 = vadd.f32 %v1362_v22, %v1162_v45 }
 0x324   : > { %1202 = vst [vmem:[%s2097_s14 + $0x58] sm:$0xff] %v1168_v44 }
 0x325   : > { %1201 = vst [vmem:[%s2097_s14 + $0x50] sm:$0xff] %v1163_v46  ;;  %v1598_v47 = vpop.f32.mrb[8].mxu1 }
 0x326   : > { %v1178_v48 = vadd.f32 %v1598_v47, %v1362_v22  ;;  %v1172_v49 = vpop.f32.mrb[9].mxu1 }
 0x327   : > { %v1173_v50 = vadd.f32 %v1362_v22, %v1172_v49 }
 0x328   : > { %1204 = vst [vmem:[%s2097_s14 + $0x68] sm:$0xff] %v1178_v48 }
 0x329   : > { %1203 = vst [vmem:[%s2097_s14 + $0x60] sm:$0xff] %v1173_v50  ;;  %v1601_v51 = vpop.f32.mrb[10].mxu1 }
 0x32a   : > { %v1188_v52 = vadd.f32 %v1601_v51, %v1362_v22  ;;  %v1182_v53 = vpop.f32.mrb[11].mxu1 }
 0x32b   : > { %v1183_v54 = vadd.f32 %v1362_v22, %v1182_v53 }
 0x32c   : > { %1206 = vst [vmem:[%s2097_s14 + $0x78] sm:$0xff] %v1188_v52 }
 0x32d   : > { %1205 = vst [vmem:[%s2097_s14 + $0x70] sm:$0xff] %v1183_v54 }
 0x32e PF: > { %s1369_s13 = sshll.u32 %s1902_s30, 11  ;;  %s1221_s22 = sshll.u32 %s2097_s14, 4  ;;  %s2314_s22 = int_to_ptr.vmem [resolvable:$true] %s1221_s22 }
 0x32f   : > { %s2311_s9 = scalar_lea.hbm %s2383_s7, %s1369_s13  ;;  %s2400_s12 = sand.u32 1, %s1882_s25  }
 0x330   : > { %s2318_s16 = scalar_lea.sflag [#allocation5], %s2400_s12  ;;  %s1804_s20 = scalar_lea.vmem %s2314_s22, 2048 }
 0x331   : > { %p1805_p8 = scmp.ne.s32.totalorder %s2314_s22, %s1804_s20  ;;  %s1917_s30 = smov [#allocation4]  }
 0x332   : > { %s1808_s21 = sshll.u32 %s1917_s30, 4  ;;  %s1809_s21 = int_to_ptr.vmem [resolvable:$false] %s1808_s21 }
 0x333   : > { %p1806_p9 = pnand %p1805_p8, %p2032_p7  ;;  %s1810_s29 = scalar_lea.vmem %s1809_s21, 4096 }
 0x334   : > { %p1811_p11 = scmp.lt.s32.totalorder %s2314_s22, %s1809_s21  ;;  %p1812_p13 = scmp.lt.s32.totalorder %s1810_s29, %s1804_s20 }
 0x335   : > { %p1807_p10 = pneg %p1806_p9 }
 0x336   : > { %p1813_p0 = por %p1812_p13, %p1811_p11 }
 0x338   : > { %p1814_p1 = pnand %p1813_p0, %p1807_p10 }
 0x33a   : > { %1817 = shalt.err (!%p1814_p1)
}
 0x33b   : > { %s1818_s14 = scalar_lea.hbm %s2311_s9, 2048  ;;  %s1822_s15 = scalar_lea.hbm %s2383_s7, 8192 }
 0x33c   : > { %p1819_p2 = scmp.ne.s32.totalorder %s2311_s9, %s1818_s14  ;;  %p1823_p5 = scmp.lt.u32.totalorder %s2311_s9, %s2383_s7 }
 0x33d   : > { %p1824_p6 = scmp.lt.u32.totalorder %s1822_s15, %s1818_s14  ;;  %p1826_p9 = scmp.lt.u32.totalorder %s1818_s14, %s2311_s9 }
 0x33e   : > { %p1820_p3 = pnand %p1819_p2, %p2032_p7 }
 0x33f   : > { %p1825_p8 = por %p1824_p6, %p1823_p5 }
 0x340   : > { %p1821_p4 = pneg %p1820_p3 }
 0x341   : > { %p1827_p10 = por %p1826_p9, %p1825_p8 }
 0x343   : > { %p1828_p11 = pnand %p1827_p10, %p1821_p4 }
 0x345   : > { %1831 = shalt.err (!%p1828_p11)
}
 0x346   : > { %s1918_s0 = smov 128   ;;  %s1919_s8 = smov 8  }
 0x347   : > { %1714 = dma.vmem_to_hbm [thread:$0]  (%p2032_p7), %s2314_s22, 2048, %s2311_s9, %s2318_s16, %s1918_s0, %s1918_s0, %s1919_s8  }
 0x348 PF: > { %p1720_p13 = scmp.ge.s32.totalorder %s1914_s10, 2  ;;  %s1236_s20 = sand.u32 1, %s1878_s24  }
 0x349   : > { %s1237_s30 = scalar_lea.sflag [#allocation5], %s1236_s20 }
 0x34a   : > { %p1717_p0 = pnand %p1720_p13, %p2040_p12 }
 0x34c   : > { %1873 = dma.done.wait (!%p1717_p0), %s1237_s30, 2048  }
 0x34d   : > { %1875 = vsyncadd (!%p1717_p0), %s1237_s30, 4294965248  ;;  %s20_s10 = sadd.s32 1, %s1914_s10   ;;  %s2402_s29 = sld [smem:[#allocation7_spill]] }
 0x34e   : > { %p17_p1 = scmp.ge.s32.totalorder %s20_s10, 10   ;;  %s2403_s30 = sld [smem:[#allocation8_spill]] }
 0x34f   : > { %s2404_s8 = sld [smem:[#allocation9_spill]]  ;;  %s2405_s9 = sld [smem:[#allocation10_spill]] }
 0x350   : > { %s2406_s24 = smov %s1882_s25  ;;  %s2407_s25 = smov %s1886_s26 }
 0x351   : > { %s2408_s26 = smov %s2045_s23  ;;  %s2409_s27 = smov %s1894_s28 }
 0x352   : > { %s2410_s28 = smov %s2048_s11  ;;  %19 = sbr.rel (!%p17_p1) target bundleno = 8 (0x8), region = 140 }
 0x359   :  { %1242 = vsyncpa [#allocation5], 1 }
 0x35a   :  { %1244 = vsyncpa [#allocation5 + $0x1], 1 }

</bundles_post_ra>
